<compile_context>
chip_gen: v7x
topology: tpu7x:2x2x1
jax: 0.10.0
libtpu: 0.0.40
codegen_flags: <defaults>
</compile_context>

<pallas_src>
import numpy as np
import jax
import jax.numpy as jnp
from jax import lax
from jax.experimental import pallas as pl
from jax.experimental.pallas import tpu as pltpu


_MARGIN = 128  # head/tail lane slack in the padded-activation scratch


def _round_up(x, m):
    return (x + m - 1) // m * m


def _fold_bn_into_weights(w_oihw, bn, eps=1e-5):
    """Fold eval-mode BatchNorm scale into the conv weights.

    Returns (wT, b): wT is (C_out, 9*C_in) bf16 in tap-major column order
    (tap = kh*3 + kw), b is the remaining per-channel bias in f32.
    """
    gamma, beta, mean, var = bn
    s = gamma / jnp.sqrt(var + eps)                                # (C,)
    b = beta - mean * s                                            # (C,)
    o = w_oihw.shape[0]
    wt = jnp.transpose(w_oihw, (0, 2, 3, 1)).reshape(o, -1)        # (O, 9*I)
    wt = (wt * s[:, None]).astype(jnp.bfloat16)
    return wt, b.astype(jnp.float32)


def _pick_batch_block(n, per_image_bytes, budget_bytes=24 << 20):
    """Largest divisor of n fitting the VMEM budget, keeping >= 2 grid steps."""
    cap = max(1, n // 2)          # v7x megacore: never collapse to a 1-step grid
    best = 1
    for d in range(1, cap + 1):
        if n % d == 0 and d * per_image_bytes <= budget_bytes:
            best = d
    return best


@jax.jit
def basic_block_pallas(x_nchw, w1_oihw, bn1, w2_oihw, bn2, gammas=None):
    """Fused BasicBlock forward. `gammas` is accepted but unused (as in PyTorch)."""
    N, C, H, W = x_nchw.shape
    Hp, Wp = H + 2, W + 2
    L = Hp * Wp                      # per-image padded flat length
    S = _round_up(L, 128)            # per-image lane stride (128-aligned blocks)
    Kc = 9 * C

    # ---- fold BN (eval) into the conv weights / a per-channel bias ----------
    w1t, b1 = _fold_bn_into_weights(w1_oihw, bn1)
    w2t, b2 = _fold_bn_into_weights(w2_oihw, bn2)
    b1 = b1.reshape(C, 1)
    b2 = b2.reshape(C, 1)

    # ---- images per grid step from a VMEM byte budget ------------------------
    # per-step bytes ~ Nb*S*(x bf16 x2 + out f32 x2 + pad bf16 + col bf16 + mask)
    per_img = S * (32 * C + 8)
    Nb = _pick_batch_block(N, per_img)
    Mq = Nb * S
    steps = N // Nb
    vmem_limit = int(min(max(2 * Nb * per_img, 16 << 20), 48 << 20))

    # ---- layout plumbing: channel-major, zero-padded, per-image stride S -----
    xp = jnp.pad(jnp.transpose(x_nchw, (1, 0, 2, 3)),
                 ((0, 0), (0, 0), (1, 1), (1, 1)))                 # (C,N,Hp,Wp)
    xp = xp.reshape(C, N, L)
    xp = jnp.pad(xp, ((0, 0), (0, 0), (0, S - L)))                 # (C,N,S)
    xp = xp.reshape(C, N * S).astype(jnp.bfloat16)

    # {0,1} mask of valid ("center") lane positions within one grid step.
    pos = np.arange(S)
    ph, pw = pos // Wp, pos % Wp
    m_img = ((ph >= 1) & (ph <= H) & (pw >= 1) & (pw <= W)).astype(np.float32)
    mask = jnp.asarray(np.tile(m_img, Nb)).reshape(1, Mq)

    def kernel(x_ref, w1_ref, b1_ref, w2_ref, b2_ref, mask_ref, out_ref,
               pad_ref, col_ref):
        # Zero the head/tail slack each step (only garbage lanes read it, but
        # keep it deterministic; safe under megacore sharding).
        pad_ref[:, 0:_MARGIN] = jnp.zeros((C, _MARGIN), pad_ref.dtype)
        pad_ref[:, _MARGIN + Mq:_MARGIN + Mq + _MARGIN] = jnp.zeros(
            (C, _MARGIN), pad_ref.dtype)

        def conv(w_ref):
            # im2col: 9 contiguous lane-dense slices of the padded buffer,
            # written as full-lane row blocks of col; then ONE MXU matmul
            # with K = 9*C producing the (C, Mq) result directly.
            for kh in range(3):
                for kw in range(3):
                    t = kh * 3 + kw
                    d = (kh - 1) * Wp + (kw - 1)
                    col_ref[t * C:(t + 1) * C, :] = \
                        pad_ref[:, _MARGIN + d:_MARGIN + d + Mq]
            return jnp.dot(w_ref[...], col_ref[...],
                           preferred_element_type=jnp.float32)

        # ---- conv1 -> bn1(folded) -> relu ----
        pad_ref[:, _MARGIN:_MARGIN + Mq] = x_ref[...]   # aligned full-slab store
        y = jnp.maximum(conv(w1_ref) + b1_ref[...], 0.0)          # (C, Mq) f32
        # zero non-center lanes so they serve as conv2's zero padding / halos
        y = y * mask_ref[...]

        # ---- conv2 -> bn2(folded) -> + identity -> relu ----
        pad_ref[:, _MARGIN:_MARGIN + Mq] = y.astype(pad_ref.dtype)
        z = conv(w2_ref) + b2_ref[...] + x_ref[...].astype(jnp.float32)
        out_ref[...] = jnp.maximum(z, 0.0)                # lane-dense, unmasked

    out = pl.pallas_call(
        kernel,
        out_shape=jax.ShapeDtypeStruct((C, N * S), jnp.float32),
        grid=(steps,),
        in_specs=[
            pl.BlockSpec((C, Mq), lambda n: (0, n)),      # padded x (bf16)
            pl.BlockSpec((C, Kc), lambda n: (0, 0)),      # folded conv1 weights
            pl.BlockSpec((C, 1), lambda n: (0, 0)),       # bn1 bias
            pl.BlockSpec((C, Kc), lambda n: (0, 0)),      # folded conv2 weights
            pl.BlockSpec((C, 1), lambda n: (0, 0)),       # bn2 bias
            pl.BlockSpec((1, Mq), lambda n: (0, 0)),      # center-position mask
        ],
        out_specs=pl.BlockSpec((C, Mq), lambda n: (0, n)),
        scratch_shapes=[
            pltpu.VMEM((C, Mq + 2 * _MARGIN), jnp.bfloat16),  # padded activations
            pltpu.VMEM((Kc, Mq), jnp.bfloat16),               # im2col buffer
        ],
        compiler_params=pltpu.CompilerParams(
            dimension_semantics=("parallel",),
            vmem_limit_bytes=vmem_limit),
    )(xp, w1t, b1, w2t, b2, mask)

    # Un-pad the slab: (C, N*S) -> (N, C, H, W).  Layout plumbing only.
    o = out.reshape(C, N, S)[:, :, :L].reshape(C, N, Hp, Wp)[:, :, 1:H + 1, 1:W + 1]
    return jnp.transpose(o, (1, 0, 2, 3))


def _reference(x_nchw, w1_oihw, bn1, w2_oihw, bn2):
    """Pure-JAX reference using the same folded bf16 weights / f32 accumulation."""
    N, C, H, W = x_nchw.shape
    w1t, b1 = _fold_bn_into_weights(w1_oihw, bn1)
    w2t, b2 = _fold_bn_into_weights(w2_oihw, bn2)

    x = jnp.transpose(x_nchw, (0, 2, 3, 1)).astype(jnp.bfloat16)   # NHWC
    dn = ("NHWC", "HWIO", "NHWC")

    def conv(u, wt):
        w = jnp.transpose(wt.reshape(C, 3, 3, C), (1, 2, 3, 0))    # HWIO bf16
        return lax.conv_general_dilated(u, w, (1, 1), "SAME",
                                        dimension_numbers=dn,
                                        preferred_element_type=jnp.float32)

    y = jnp.maximum(conv(x, w1t) + b1, 0.0)
    z = conv(y.astype(jnp.bfloat16), w2t) + b2 + x.astype(jnp.float32)
    return jnp.transpose(jnp.maximum(z, 0.0), (0, 3, 1, 2))


if __name__ == "__main__":
    key = jax.random.PRNGKey(0)
    keys = jax.random.split(key, 12)

    N, C, Hs, Ws = 2, 8, 16, 16     # inplanes == planes == 8, stride=1, no downsample

    x = jax.random.normal(keys[0], (N, C, Hs, Ws), jnp.float32)
    gammas = jax.random.normal(keys[1], (N, C), jnp.float32)   # unused, as in PyTorch

    w1 = jax.random.normal(keys[2], (C, C, 3, 3), jnp.float32) * 0.1  # OIHW
    w2 = jax.random.normal(keys[3], (C, C, 3, 3), jnp.float32) * 0.1

    bn1 = (jax.random.uniform(keys[4], (C,), minval=0.5, maxval=1.5),
           jax.random.normal(keys[5], (C,)) * 0.1,
           jax.random.normal(keys[6], (C,)) * 0.1,
           jax.random.uniform(keys[7], (C,), minval=0.5, maxval=1.5))
    bn2 = (jax.random.uniform(keys[8], (C,), minval=0.5, maxval=1.5),
           jax.random.normal(keys[9], (C,)) * 0.1,
           jax.random.normal(keys[10], (C,)) * 0.1,
           jax.random.uniform(keys[11], (C,), minval=0.5, maxval=1.5))

    out = jax.block_until_ready(basic_block_pallas(x, w1, bn1, w2, bn2, gammas))
    ref = jax.block_until_ready(_reference(x, w1, bn1, w2, bn2))

    assert out.shape == (N, C, Hs, Ws)
    max_err = float(jnp.max(jnp.abs(out - ref)))
    assert jnp.allclose(out, ref, rtol=5e-3, atol=5e-3), max_err

    print("KERNEL_OK")
</pallas_src>

<mosaic_0001>
module attributes {stable_mosaic.version = 11 : i64} {
  func.func @kernel(%arg0: i32, %arg1: memref<8x384xbf16, #tpu.memory_space<vmem>>, %arg2: memref<8x72xbf16, #tpu.memory_space<vmem>>, %arg3: memref<8x1xf32, #tpu.memory_space<vmem>>, %arg4: memref<8x72xbf16, #tpu.memory_space<vmem>>, %arg5: memref<8x1xf32, #tpu.memory_space<vmem>>, %arg6: memref<1x384xf32, #tpu.memory_space<vmem>>, %arg7: memref<8x384xf32, #tpu.memory_space<vmem>>, %arg8: memref<8x640xbf16, #tpu.memory_space<vmem>>, %arg9: memref<72x384xbf16, #tpu.memory_space<vmem>>) attributes {dimension_semantics = [#tpu.dimension_semantics<parallel>], iteration_bounds = array<i64: 2>, scalar_prefetch = 0 : i64, scratch_operands = 2 : i64, tpu.core_type = #tpu.core_type<tc>, window_params = [{transform_indices = @transform_0, window_bounds = array<i64: 8, 384>}, {pipeline_mode = #tpu.pipeline_mode<synchronous>, transform_indices = @transform_1, window_bounds = array<i64: 8, 72>}, {pipeline_mode = #tpu.pipeline_mode<synchronous>, transform_indices = @transform_2, window_bounds = array<i64: 8, 1>}, {pipeline_mode = #tpu.pipeline_mode<synchronous>, transform_indices = @transform_3, window_bounds = array<i64: 8, 72>}, {pipeline_mode = #tpu.pipeline_mode<synchronous>, transform_indices = @transform_4, window_bounds = array<i64: 8, 1>}, {pipeline_mode = #tpu.pipeline_mode<synchronous>, transform_indices = @transform_5, window_bounds = array<i64: 1, 384>}, {transform_indices = @transform_6, window_bounds = array<i64: 8, 384>}]} {
    %cst = arith.constant 0.000000e+00 : bf16
    %0 = vector.broadcast %cst : bf16 to vector<8x128xbf16>
    %c0 = arith.constant 0 : index
    %c0_0 = arith.constant 0 : index
    %1 = vector.load %arg8[%c0, %c0_0] : memref<8x640xbf16, #tpu.memory_space<vmem>>, vector<8x128xbf16>
    tpu.vector_store %arg8[%c0, %c0_0], %0 {strides = array<i32>} : memref<8x640xbf16, #tpu.memory_space<vmem>>, vector<8x128xbf16>,
    %cst_1 = arith.constant 0.000000e+00 : bf16
    %2 = vector.broadcast %cst_1 : bf16 to vector<8x128xbf16>
    %c0_2 = arith.constant 0 : index
    %c512 = arith.constant 512 : index
    %3 = vector.load %arg8[%c0_2, %c512] : memref<8x640xbf16, #tpu.memory_space<vmem>>, vector<8x128xbf16>
    tpu.vector_store %arg8[%c0_2, %c512], %2 {strides = array<i32>} : memref<8x640xbf16, #tpu.memory_space<vmem>>, vector<8x128xbf16>,
    %c0_3 = arith.constant 0 : index
    %c0_4 = arith.constant 0 : index
    %4 = vector.load %arg1[%c0_3, %c0_4] : memref<8x384xbf16, #tpu.memory_space<vmem>>, vector<8x384xbf16>
    %c0_5 = arith.constant 0 : index
    %c128 = arith.constant 128 : index
    %5 = vector.load %arg8[%c0_5, %c128] : memref<8x640xbf16, #tpu.memory_space<vmem>>, vector<8x384xbf16>
    tpu.vector_store %arg8[%c0_5, %c128], %4 {strides = array<i32>} : memref<8x640xbf16, #tpu.memory_space<vmem>>, vector<8x384xbf16>,
    %c0_6 = arith.constant 0 : index
    %c109 = arith.constant 109 : index
    %6 = vector.load %arg8[%c0_6, %c109] : memref<8x640xbf16, #tpu.memory_space<vmem>>, vector<8x384xbf16>
    %c0_7 = arith.constant 0 : index
    %c0_8 = arith.constant 0 : index
    %7 = vector.load %arg9[%c0_7, %c0_8] : memref<72x384xbf16, #tpu.memory_space<vmem>>, vector<8x384xbf16>
    tpu.vector_store %arg9[%c0_7, %c0_8], %6 {strides = array<i32>} : memref<72x384xbf16, #tpu.memory_space<vmem>>, vector<8x384xbf16>,
    %c0_9 = arith.constant 0 : index
    %c110 = arith.constant 110 : index
    %8 = vector.load %arg8[%c0_9, %c110] : memref<8x640xbf16, #tpu.memory_space<vmem>>, vector<8x384xbf16>
    %c8 = arith.constant 8 : index
    %c0_10 = arith.constant 0 : index
    %9 = vector.load %arg9[%c8, %c0_10] : memref<72x384xbf16, #tpu.memory_space<vmem>>, vector<8x384xbf16>
    tpu.vector_store %arg9[%c8, %c0_10], %8 {strides = array<i32>} : memref<72x384xbf16, #tpu.memory_space<vmem>>, vector<8x384xbf16>,
    %c0_11 = arith.constant 0 : index
    %c111 = arith.constant 111 : index
    %10 = vector.load %arg8[%c0_11, %c111] : memref<8x640xbf16, #tpu.memory_space<vmem>>, vector<8x384xbf16>
    %c16 = arith.constant 16 : index
    %c0_12 = arith.constant 0 : index
    %11 = vector.load %arg9[%c16, %c0_12] : memref<72x384xbf16, #tpu.memory_space<vmem>>, vector<8x384xbf16>
    tpu.vector_store %arg9[%c16, %c0_12], %10 {strides = array<i32>} : memref<72x384xbf16, #tpu.memory_space<vmem>>, vector<8x384xbf16>,
    %c0_13 = arith.constant 0 : index
    %c127 = arith.constant 127 : index
    %12 = vector.load %arg8[%c0_13, %c127] : memref<8x640xbf16, #tpu.memory_space<vmem>>, vector<8x384xbf16>
    %c24 = arith.constant 24 : index
    %c0_14 = arith.constant 0 : index
    %13 = vector.load %arg9[%c24, %c0_14] : memref<72x384xbf16, #tpu.memory_space<vmem>>, vector<8x384xbf16>
    tpu.vector_store %arg9[%c24, %c0_14], %12 {strides = array<i32>} : memref<72x384xbf16, #tpu.memory_space<vmem>>, vector<8x384xbf16>,
    %c0_15 = arith.constant 0 : index
    %c128_16 = arith.constant 128 : index
    %14 = vector.load %arg8[%c0_15, %c128_16] : memref<8x640xbf16, #tpu.memory_space<vmem>>, vector<8x384xbf16>
    %c32 = arith.constant 32 : index
    %c0_17 = arith.constant 0 : index
    %15 = vector.load %arg9[%c32, %c0_17] : memref<72x384xbf16, #tpu.memory_space<vmem>>, vector<8x384xbf16>
    tpu.vector_store %arg9[%c32, %c0_17], %14 {strides = array<i32>} : memref<72x384xbf16, #tpu.memory_space<vmem>>, vector<8x384xbf16>,
    %c0_18 = arith.constant 0 : index
    %c129 = arith.constant 129 : index
    %16 = vector.load %arg8[%c0_18, %c129] : memref<8x640xbf16, #tpu.memory_space<vmem>>, vector<8x384xbf16>
    %c40 = arith.constant 40 : index
    %c0_19 = arith.constant 0 : index
    %17 = vector.load %arg9[%c40, %c0_19] : memref<72x384xbf16, #tpu.memory_space<vmem>>, vector<8x384xbf16>
    tpu.vector_store %arg9[%c40, %c0_19], %16 {strides = array<i32>} : memref<72x384xbf16, #tpu.memory_space<vmem>>, vector<8x384xbf16>,
    %c0_20 = arith.constant 0 : index
    %c145 = arith.constant 145 : index
    %18 = vector.load %arg8[%c0_20, %c145] : memref<8x640xbf16, #tpu.memory_space<vmem>>, vector<8x384xbf16>
    %c48 = arith.constant 48 : index
    %c0_21 = arith.constant 0 : index
    %19 = vector.load %arg9[%c48, %c0_21] : memref<72x384xbf16, #tpu.memory_space<vmem>>, vector<8x384xbf16>
    tpu.vector_store %arg9[%c48, %c0_21], %18 {strides = array<i32>} : memref<72x384xbf16, #tpu.memory_space<vmem>>, vector<8x384xbf16>,
    %c0_22 = arith.constant 0 : index
    %c146 = arith.constant 146 : index
    %20 = vector.load %arg8[%c0_22, %c146] : memref<8x640xbf16, #tpu.memory_space<vmem>>, vector<8x384xbf16>
    %c56 = arith.constant 56 : index
    %c0_23 = arith.constant 0 : index
    %21 = vector.load %arg9[%c56, %c0_23] : memref<72x384xbf16, #tpu.memory_space<vmem>>, vector<8x384xbf16>
    tpu.vector_store %arg9[%c56, %c0_23], %20 {strides = array<i32>} : memref<72x384xbf16, #tpu.memory_space<vmem>>, vector<8x384xbf16>,
    %c0_24 = arith.constant 0 : index
    %c147 = arith.constant 147 : index
    %22 = vector.load %arg8[%c0_24, %c147] : memref<8x640xbf16, #tpu.memory_space<vmem>>, vector<8x384xbf16>
    %c64 = arith.constant 64 : index
    %c0_25 = arith.constant 0 : index
    %23 = vector.load %arg9[%c64, %c0_25] : memref<72x384xbf16, #tpu.memory_space<vmem>>, vector<8x384xbf16>
    tpu.vector_store %arg9[%c64, %c0_25], %22 {strides = array<i32>} : memref<72x384xbf16, #tpu.memory_space<vmem>>, vector<8x384xbf16>,
    %c0_26 = arith.constant 0 : index
    %c0_27 = arith.constant 0 : index
    %24 = vector.load %arg2[%c0_26, %c0_27] : memref<8x72xbf16, #tpu.memory_space<vmem>>, vector<8x72xbf16>
    %c0_28 = arith.constant 0 : index
    %c0_29 = arith.constant 0 : index
    %25 = vector.load %arg9[%c0_28, %c0_29] : memref<72x384xbf16, #tpu.memory_space<vmem>>, vector<72x384xbf16>
    %cst_30 = arith.constant dense<0.000000e+00> : vector<8x384xf32>
    %26 = tpu.matmul %24, %25, %cst_30 {dimension_numbers = #tpu.dot_dimension_numbers<[1], [0], [0], [1], [0, 0, 1, 1], [], []>} : vector<8x72xbf16>, vector<72x384xbf16>, vector<8x384xf32> -> vector<8x384xf32>
    %c0_31 = arith.constant 0 : index
    %c0_32 = arith.constant 0 : index
    %27 = vector.load %arg3[%c0_31, %c0_32] : memref<8x1xf32, #tpu.memory_space<vmem>>, vector<8x1xf32>
    %28 = vector.broadcast %27 : vector<8x1xf32> to vector<8x384xf32>
    %29 = arith.addf %26, %28 : vector<8x384xf32>
    %cst_33 = arith.constant 0.000000e+00 : f32
    %30 = vector.broadcast %cst_33 : f32 to vector<8x384xf32>
    %31 = arith.maximumf %29, %30 : vector<8x384xf32>
    %c0_34 = arith.constant 0 : index
    %c0_35 = arith.constant 0 : index
    %32 = vector.load %arg6[%c0_34, %c0_35] : memref<1x384xf32, #tpu.memory_space<vmem>>, vector<1x384xf32>
    %33 = vector.broadcast %32 : vector<1x384xf32> to vector<8x384xf32>
    %34 = arith.mulf %31, %33 : vector<8x384xf32>
    %35 = arith.truncf %34 : vector<8x384xf32> to vector<8x384xbf16>
    %c0_36 = arith.constant 0 : index
    %c128_37 = arith.constant 128 : index
    %36 = vector.load %arg8[%c0_36, %c128_37] : memref<8x640xbf16, #tpu.memory_space<vmem>>, vector<8x384xbf16>
    tpu.vector_store %arg8[%c0_36, %c128_37], %35 {strides = array<i32>} : memref<8x640xbf16, #tpu.memory_space<vmem>>, vector<8x384xbf16>,
    %c0_38 = arith.constant 0 : index
    %c109_39 = arith.constant 109 : index
    %37 = vector.load %arg8[%c0_38, %c109_39] : memref<8x640xbf16, #tpu.memory_space<vmem>>, vector<8x384xbf16>
    %c0_40 = arith.constant 0 : index
    %c0_41 = arith.constant 0 : index
    %38 = vector.load %arg9[%c0_40, %c0_41] : memref<72x384xbf16, #tpu.memory_space<vmem>>, vector<8x384xbf16>
    tpu.vector_store %arg9[%c0_40, %c0_41], %37 {strides = array<i32>} : memref<72x384xbf16, #tpu.memory_space<vmem>>, vector<8x384xbf16>,
    %c0_42 = arith.constant 0 : index
    %c110_43 = arith.constant 110 : index
    %39 = vector.load %arg8[%c0_42, %c110_43] : memref<8x640xbf16, #tpu.memory_space<vmem>>, vector<8x384xbf16>
    %c8_44 = arith.constant 8 : index
    %c0_45 = arith.constant 0 : index
    %40 = vector.load %arg9[%c8_44, %c0_45] : memref<72x384xbf16, #tpu.memory_space<vmem>>, vector<8x384xbf16>
    tpu.vector_store %arg9[%c8_44, %c0_45], %39 {strides = array<i32>} : memref<72x384xbf16, #tpu.memory_space<vmem>>, vector<8x384xbf16>,
    %c0_46 = arith.constant 0 : index
    %c111_47 = arith.constant 111 : index
    %41 = vector.load %arg8[%c0_46, %c111_47] : memref<8x640xbf16, #tpu.memory_space<vmem>>, vector<8x384xbf16>
    %c16_48 = arith.constant 16 : index
    %c0_49 = arith.constant 0 : index
    %42 = vector.load %arg9[%c16_48, %c0_49] : memref<72x384xbf16, #tpu.memory_space<vmem>>, vector<8x384xbf16>
    tpu.vector_store %arg9[%c16_48, %c0_49], %41 {strides = array<i32>} : memref<72x384xbf16, #tpu.memory_space<vmem>>, vector<8x384xbf16>,
    %c0_50 = arith.constant 0 : index
    %c127_51 = arith.constant 127 : index
    %43 = vector.load %arg8[%c0_50, %c127_51] : memref<8x640xbf16, #tpu.memory_space<vmem>>, vector<8x384xbf16>
    %c24_52 = arith.constant 24 : index
    %c0_53 = arith.constant 0 : index
    %44 = vector.load %arg9[%c24_52, %c0_53] : memref<72x384xbf16, #tpu.memory_space<vmem>>, vector<8x384xbf16>
    tpu.vector_store %arg9[%c24_52, %c0_53], %43 {strides = array<i32>} : memref<72x384xbf16, #tpu.memory_space<vmem>>, vector<8x384xbf16>,
    %c0_54 = arith.constant 0 : index
    %c128_55 = arith.constant 128 : index
    %45 = vector.load %arg8[%c0_54, %c128_55] : memref<8x640xbf16, #tpu.memory_space<vmem>>, vector<8x384xbf16>
    %c32_56 = arith.constant 32 : index
    %c0_57 = arith.constant 0 : index
    %46 = vector.load %arg9[%c32_56, %c0_57] : memref<72x384xbf16, #tpu.memory_space<vmem>>, vector<8x384xbf16>
    tpu.vector_store %arg9[%c32_56, %c0_57], %45 {strides = array<i32>} : memref<72x384xbf16, #tpu.memory_space<vmem>>, vector<8x384xbf16>,
    %c0_58 = arith.constant 0 : index
    %c129_59 = arith.constant 129 : index
    %47 = vector.load %arg8[%c0_58, %c129_59] : memref<8x640xbf16, #tpu.memory_space<vmem>>, vector<8x384xbf16>
    %c40_60 = arith.constant 40 : index
    %c0_61 = arith.constant 0 : index
    %48 = vector.load %arg9[%c40_60, %c0_61] : memref<72x384xbf16, #tpu.memory_space<vmem>>, vector<8x384xbf16>
    tpu.vector_store %arg9[%c40_60, %c0_61], %47 {strides = array<i32>} : memref<72x384xbf16, #tpu.memory_space<vmem>>, vector<8x384xbf16>,
    %c0_62 = arith.constant 0 : index
    %c145_63 = arith.constant 145 : index
    %49 = vector.load %arg8[%c0_62, %c145_63] : memref<8x640xbf16, #tpu.memory_space<vmem>>, vector<8x384xbf16>
    %c48_64 = arith.constant 48 : index
    %c0_65 = arith.constant 0 : index
    %50 = vector.load %arg9[%c48_64, %c0_65] : memref<72x384xbf16, #tpu.memory_space<vmem>>, vector<8x384xbf16>
    tpu.vector_store %arg9[%c48_64, %c0_65], %49 {strides = array<i32>} : memref<72x384xbf16, #tpu.memory_space<vmem>>, vector<8x384xbf16>,
    %c0_66 = arith.constant 0 : index
    %c146_67 = arith.constant 146 : index
    %51 = vector.load %arg8[%c0_66, %c146_67] : memref<8x640xbf16, #tpu.memory_space<vmem>>, vector<8x384xbf16>
    %c56_68 = arith.constant 56 : index
    %c0_69 = arith.constant 0 : index
    %52 = vector.load %arg9[%c56_68, %c0_69] : memref<72x384xbf16, #tpu.memory_space<vmem>>, vector<8x384xbf16>
    tpu.vector_store %arg9[%c56_68, %c0_69], %51 {strides = array<i32>} : memref<72x384xbf16, #tpu.memory_space<vmem>>, vector<8x384xbf16>,
    %c0_70 = arith.constant 0 : index
    %c147_71 = arith.constant 147 : index
    %53 = vector.load %arg8[%c0_70, %c147_71] : memref<8x640xbf16, #tpu.memory_space<vmem>>, vector<8x384xbf16>
    %c64_72 = arith.constant 64 : index
    %c0_73 = arith.constant 0 : index
    %54 = vector.load %arg9[%c64_72, %c0_73] : memref<72x384xbf16, #tpu.memory_space<vmem>>, vector<8x384xbf16>
    tpu.vector_store %arg9[%c64_72, %c0_73], %53 {strides = array<i32>} : memref<72x384xbf16, #tpu.memory_space<vmem>>, vector<8x384xbf16>,
    %c0_74 = arith.constant 0 : index
    %c0_75 = arith.constant 0 : index
    %55 = vector.load %arg4[%c0_74, %c0_75] : memref<8x72xbf16, #tpu.memory_space<vmem>>, vector<8x72xbf16>
    %c0_76 = arith.constant 0 : index
    %c0_77 = arith.constant 0 : index
    %56 = vector.load %arg9[%c0_76, %c0_77] : memref<72x384xbf16, #tpu.memory_space<vmem>>, vector<72x384xbf16>
    %cst_78 = arith.constant dense<0.000000e+00> : vector<8x384xf32>
    %57 = tpu.matmul %55, %56, %cst_78 {dimension_numbers = #tpu.dot_dimension_numbers<[1], [0], [0], [1], [0, 0, 1, 1], [], []>} : vector<8x72xbf16>, vector<72x384xbf16>, vector<8x384xf32> -> vector<8x384xf32>
    %c0_79 = arith.constant 0 : index
    %c0_80 = arith.constant 0 : index
    %58 = vector.load %arg5[%c0_79, %c0_80] : memref<8x1xf32, #tpu.memory_space<vmem>>, vector<8x1xf32>
    %59 = vector.broadcast %58 : vector<8x1xf32> to vector<8x384xf32>
    %60 = arith.addf %57, %59 : vector<8x384xf32>
    %c0_81 = arith.constant 0 : index
    %c0_82 = arith.constant 0 : index
    %61 = vector.load %arg1[%c0_81, %c0_82] : memref<8x384xbf16, #tpu.memory_space<vmem>>, vector<8x384xbf16>
    %62 = arith.extf %61 : vector<8x384xbf16> to vector<8x384xf32>
    %63 = arith.addf %60, %62 : vector<8x384xf32>
    %cst_83 = arith.constant 0.000000e+00 : f32
    %64 = vector.broadcast %cst_83 : f32 to vector<8x384xf32>
    %65 = arith.maximumf %63, %64 : vector<8x384xf32>
    %c0_84 = arith.constant 0 : index
    %c0_85 = arith.constant 0 : index
    %66 = vector.load %arg7[%c0_84, %c0_85] : memref<8x384xf32, #tpu.memory_space<vmem>>, vector<8x384xf32>
    tpu.vector_store %arg7[%c0_84, %c0_85], %65 {strides = array<i32>} : memref<8x384xf32, #tpu.memory_space<vmem>>, vector<8x384xf32>,
    return
  }
  func.func @transform_0(%arg0: i32) -> (i32, i32) {
    %c0_i32 = arith.constant 0 : i32
    %c0_i32_0 = arith.constant 0 : i32
    return %c0_i32, %arg0 : i32, i32
  }
  func.func @transform_1(%arg0: i32) -> (i32, i32) {
    %c0_i32 = arith.constant 0 : i32
    %c0_i32_0 = arith.constant 0 : i32
    %c0_i32_1 = arith.constant 0 : i32
    return %c0_i32, %c0_i32_0 : i32, i32
  }
  func.func @transform_2(%arg0: i32) -> (i32, i32) {
    %c0_i32 = arith.constant 0 : i32
    %c0_i32_0 = arith.constant 0 : i32
    %c0_i32_1 = arith.constant 0 : i32
    return %c0_i32, %c0_i32_0 : i32, i32
  }
  func.func @transform_3(%arg0: i32) -> (i32, i32) {
    %c0_i32 = arith.constant 0 : i32
    %c0_i32_0 = arith.constant 0 : i32
    %c0_i32_1 = arith.constant 0 : i32
    return %c0_i32, %c0_i32_0 : i32, i32
  }
  func.func @transform_4(%arg0: i32) -> (i32, i32) {
    %c0_i32 = arith.constant 0 : i32
    %c0_i32_0 = arith.constant 0 : i32
    %c0_i32_1 = arith.constant 0 : i32
    return %c0_i32, %c0_i32_0 : i32, i32
  }
  func.func @transform_5(%arg0: i32) -> (i32, i32) {
    %c0_i32 = arith.constant 0 : i32
    %c0_i32_0 = arith.constant 0 : i32
    %c0_i32_1 = arith.constant 0 : i32
    return %c0_i32, %c0_i32_0 : i32, i32
  }
  func.func @transform_6(%arg0: i32) -> (i32, i32) {
    %c0_i32 = arith.constant 0 : i32
    %c0_i32_0 = arith.constant 0 : i32
    return %c0_i32, %arg0 : i32, i32
  }
}

</mosaic_0001>

<bundles_post_ra>
// kernel: basic_block_pallas.1
= control target key start
LH: loop header
LB: loop body
LE: loop exit
PB: predicated region body
PF: predicated region fallthrough
CT: control target
= control target key end

     0   :  { %s1214_s21 = smov 0   ;;  %s1384_s0 = inlined_call_operand.vmem [shape: bf16[8,768], index: 0, kind: input, shape index: {}]   ;;  %s1385_s1 = inlined_call_operand.vmem [shape: bf16[8,72], index: 1, kind: input, shape index: {}]   ;;  %s1386_s2 = inlined_call_operand.vmem [shape: f32[8,1], index: 2, kind: input, shape index: {}]   ;;  %s1387_s3 = inlined_call_operand.vmem [shape: bf16[8,72], index: 3, kind: input, shape index: {}]   ;;  %s1388_s4 = inlined_call_operand.vmem [shape: f32[8,1], index: 4, kind: input, shape index: {}]   ;;  %s1389_s5 = inlined_call_operand.vmem [shape: f32[1,384], index: 5, kind: input, shape index: {}]   ;;  %s1390_s6 = inlined_call_operand.vmem [shape: f32[8,768], index: 6, kind: output, shape index: {}]  }
   0x1 LB: > { %s1041_s22 = sadd.s32 4294967295, %s1166_s21   ;;  %p1045_p0 = scmp.ge.s32.totalorder %s1166_s21, 1  ;;  %s1166_s21 = sphi %s1214_s21, %s16_s21  }
   0x2   : > { %p213_p1 = scmp.lt.s32.totalorder %s1166_s21, 3 }
   0x4   : > { %p214_p2 = pnand %p1045_p0, %p213_p1 }
   0x5   : > { %s243_s23 = smul.u32 (!%p214_p2), 3, %s1041_s22  ;;  %v1168_v0 = vmov (!%p214_p2), 0   ;;  %s1169_s28 = smov (!%p214_p2), 18   ;;  %v1171_v5 = vmov (!%p214_p2), 0.0   ;;  %vm1178_vm0 = vmmov (!%p214_p2), 0   ;;  %v430_v8 = vld [vmem:[%s1386_s2] sm:$0xff] (!%p214_p2) }
   0x6   : > { %217 = sbr.rel (%p214_p2) target bundleno = 792 (0x318), region = 44  ;;  %256 = vst [vmem:[#allocation2] sm:$0xf] (!%p214_p2), %v1168_v0  ;;  %257 = vst [vmem:[#allocation2 + $0x10] sm:$0xf] (!%p214_p2), %v1168_v0  ;;  %554 = vmatprep.mubr.bf16.mxu0 (!%p214_p2), %v1168_v0  ;;  %1149 = vset.pattern.permute.xlu0 (!%p214_p2), %v1168_v0  ;;  %s1170_s29 = smov (!%p214_p2), 19  }
   0x7   : > { %p244_p3 = scmp.lt.s32.totalorder (!%p214_p2), %s243_s23, 5  ;;  %1102 = vmatprep.subr.bf16.mxu1 (!%p214_p2), %v1171_v5  ;;  %s1172_s30 = smov (!%p214_p2), 17   ;;  %1112 = vmatprep.mubr.msk.bf16.mxu1 (!%p214_p2), %vm1178_vm0, %v1171_v5  ;;  %vm272_vm1 = vcmask (!%p214_p2), 1043456   ;;  %vm292_vm2 = vcmask (!%p214_p2), 146432   ;;  %vm274_vm3 = vcmask (!%p214_p2), 154624   ;;  %vm310_vm4 = vcmask (!%p214_p2), 138240  }
   0x8   : > { %s1173_s7 = smov (!%p214_p2), 1   ;;  %s1174_s8 = smov (!%p214_p2), 127   ;;  %vm328_vm5 = vcmask (!%p214_p2), 7168   ;;  %vm350_vm6 = vcmask (!%p214_p2), 1039360   ;;  %vm368_vm7 = vcmask (!%p214_p2), 908288   ;;  %vm386_vm8 = vcmask (!%p214_p2), 900096  }
   0x9   : > { %s1175_s9 = smov (!%p214_p2), 111   ;;  %s1176_s10 = smov (!%p214_p2), 110   ;;  %vm404_vm9 = vcmask (!%p214_p2), 891904   ;;  %vm508_vm10 = vcmask (!%p214_p2), 588800  }
   0xa   : > { %s1177_s11 = smov (!%p214_p2), 109  }
   0xd   : > { %s1392_s23 = smov (!%p244_p3, %s243_s23), 5 }
   0xe   : > { %s1046_s24 = sshll.u32 %s1392_s23, 2 }
   0xf   : > { %s1232_s27 = scalar_lea.vmem %s1384_s0, %s1046_s24  ;;  %s1047_s24 = sshll.u32 %s1392_s23, 3 }
  0x10   : > { %v1235_v1 = vld [vmem:[%s1232_s27] sm:$0xff]  ;;  %v259_v2 = vld [vmem:[%s1232_s27 + $0x8] sm:$0xf] }
  0x11   : > { %260 = vst [vmem:[#allocation2 + $0x4] sm:$0xff] %v1235_v1  ;;  %261 = vst [vmem:[#allocation2 + $0xc] sm:$0xf] %v259_v2 }
  0x18   : > { %v281_v3 = vld [vmem:[#allocation2] sm:$0xff]  ;;  %v282_v4 = vld [vmem:[#allocation2 + $0x8] sm:$0xff] }
  0x19   : > { %285 = vrot.lane.b32.xlu1 %v281_v3, %s1169_s28  ;;  %266 = vrot.lane.b32.xlu0 %v281_v3, %s1170_s29  ;;  %v336_v6 = vld [vmem:[#allocation2 + $0xc] sm:$0xf] }
  0x1a   : > { %338 = vst [vmem:[#allocation3 + $0x38] sm:$0xf] %v336_v6  ;;  %v340_v7 = vld [vmem:[#allocation2 + $0xc] sm:$0xff] }
  0x1d   : > { %287 = vrot.lane.b32.xlu1 %v282_v4, %s1169_s28  ;;  %268 = vrot.lane.b32.xlu0 %v282_v4, %s1170_s29 }
  0x21   : > { %305 = vrot.lane.b32.xlu1 %v282_v4, %s1172_s30  ;;  %303 = vrot.lane.b32.xlu0 %v281_v3, %s1172_s30 }
  0x25   : > { %323 = vrot.lane.b32.xlu1 %v282_v4, %s1173_s7  ;;  %321 = vrot.lane.b32.xlu0 %v281_v3, %s1173_s7 }
  0x29   : > { %345 = vrot.lane.b32.xlu1 %v340_v7, %s1174_s8  ;;  %343 = vrot.lane.b32.xlu0 %v1235_v1, %s1174_s8 }
  0x2d   : > { %363 = vrot.lane.b32.xlu1 %v340_v7, %s1175_s9  ;;  %361 = vrot.lane.b32.xlu0 %v1235_v1, %s1175_s9 }
  0x31   : > { %381 = vrot.lane.b32.xlu1 %v340_v7, %s1176_s10  ;;  %379 = vrot.lane.b32.xlu0 %v1235_v1, %s1176_s10 }
  0x35   : > { %399 = vrot.lane.b32.xlu1 %v340_v7, %s1177_s11  ;;  %397 = vrot.lane.b32.xlu0 %v1235_v1, %s1177_s11 }
  0x39   : > { %433 = vperm.xlu0 %1149, %v430_v8  }
  0x8b   : > { %v286_v9 = vpop.permute.xlu1 %285  ;;  %v267_v10 = vpop.permute.xlu0 %266 }
  0x8c   : > { %v270_v11 = vrot.slane %v267_v10, 4  ;;  %v289_v14 = vrot.slane %v286_v9, 4 }
  0x8f   : > { %v288_v12 = vpop.permute.xlu1 %287  ;;  %v269_v13 = vpop.permute.xlu0 %268 }
  0x90   : > { %v290_v15 = vrot.slane %v288_v12, 4  ;;  %v271_v16 = vrot.slane %v269_v13, 4 }
  0x92   : > { %v291_v17 = vsel %vm272_vm1, %v289_v14, %v290_v15  ;;  %v294_v18 = vsel %vm292_vm2, %v288_v12, %v290_v15  ;;  %v273_v19 = vsel %vm272_vm1, %v270_v11, %v271_v16  ;;  %v276_v20 = vsel %vm274_vm3, %v269_v13, %v271_v16 }
  0x93   : > { %v293_v21 = vsel %vm292_vm2, %v286_v9, %v291_v17  ;;  %298 = vst [vmem:[#allocation3 + $0x14] sm:$0xf] %v294_v18  ;;  %v275_v22 = vsel %vm274_vm3, %v267_v10, %v273_v19  ;;  %280 = vst [vmem:[#allocation3 + $0x8] sm:$0xf] %v276_v20  ;;  %v306_v23 = vpop.permute.xlu1 %305  ;;  %v304_v24 = vpop.permute.xlu0 %303  ;;  %v411_v19 = vld [vmem:[%s1385_s1] sm:$0xf] }
  0x94   : > { %v308_v25 = vrot.slane %v306_v23, 4  ;;  %v307_v26 = vrot.slane %v304_v24, 4  ;;  %v1049_v27 = vcombine.high %v275_v22, %v293_v21  ;;  %v1048_v28 = vcombine.low %v275_v22, %v293_v21 }
  0x95   : > { %v608_v22 = vlaneseq }
  0x96   : > { %v312_v29 = vsel %vm310_vm4, %v306_v23, %v308_v25  ;;  %522 = vmatprep.subr.bf16.mxu0 %v1049_v27  ;;  %v309_v32 = vsel %vm272_vm1, %v307_v26, %v308_v25  ;;  %v606_v25 = vld [vmem:[%s1389_s5] sm:$0x7] }
  0x97   : > { %316 = vst [vmem:[#allocation3 + $0x20] sm:$0xf] %v312_v29  ;;  %v324_v30 = vpop.permute.xlu1 %323  ;;  %v322_v31 = vpop.permute.xlu0 %321  ;;  %523 = vmatpush1.bf16.msra.mxu0 %v1048_v28  ;;  %v311_v38 = vsel %vm310_vm4, %v304_v24, %v309_v32  ;;  %v609_v23 = vshrl.u32 %v608_v22, 7 }
  0x98   : > { %v326_v33 = vrot.slane %v324_v30, 4  ;;  %v325_v34 = vrot.slane %v322_v31, 4 }
  0x99   : > { %v610_v24 = vsub.s32 0, %v609_v23  ;;  %v614_v27 = vsub.s32 1, %v609_v23 }
  0x9a   : > { %v330_v35 = vsel %vm328_vm5, %v324_v30, %v326_v33  ;;  %v327_v36 = vsel %vm272_vm1, %v325_v34, %v326_v33  ;;  %v1150_v37 = vld [vmem:[#allocation3 + $0x8] ss:$12 sps:$4 sm:$0xff]   ;;  %v618_v34 = vsub.s32 2, %v609_v23 }
  0x9b   : > { %334 = vst [vmem:[#allocation3 + $0x2c] sm:$0xf] %v330_v35  ;;  %v329_v39 = vsel %vm328_vm5, %v322_v31, %v327_v36  ;;  %v346_v40 = vpop.permute.xlu1 %345  ;;  %v344_v41 = vpop.permute.xlu0 %343  ;;  %1103 = vmatpush3.bf16.msra.mxu1 %v1150_v37  ;;  %v611_v29 = vrot.slane %v606_v25, %v610_v24  ;;  %v615_v32 = vrot.slane %v606_v25, %v614_v27 }
  0x9c   : > { %v348_v42 = vrot.slane %v346_v40, 4  ;;  %v347_v43 = vrot.slane %v344_v41, 4  ;;  %v1052_v44 = vcombine.high %v311_v38, %v329_v39  ;;  %v1051_v45 = vcombine.low %v311_v38, %v329_v39  ;;  %1104 = vmatprep.subr.bf16.mxu1 %v1171_v5 }
  0x9e   : > { %v352_v46 = vsel %vm350_vm6, %v346_v40, %v348_v42  ;;  %v349_v47 = vsel %vm272_vm1, %v347_v43, %v348_v42  ;;  %524 = vmatprep.subr.bf16.mxu0 %v1052_v44 }
  0x9f   : > { %356 = vst [vmem:[#allocation3 + $0x44] sm:$0xf] %v352_v46  ;;  %v351_v48 = vsel %vm350_vm6, %v344_v41, %v349_v47  ;;  %v364_v49 = vpop.permute.xlu1 %363  ;;  %v362_v50 = vpop.permute.xlu0 %361  ;;  %525 = vmatpush1.bf16.msra.mxu0 %v1051_v45  ;;  %v619_v41 = vrot.slane %v606_v25, %v618_v34 }
  0xa0   : > { %v366_v51 = vrot.slane %v364_v49, 4  ;;  %v365_v52 = vrot.slane %v362_v50, 4  ;;  %v1055_v53 = vcombine.high %v1235_v1, %v351_v48  ;;  %v1054_v54 = vcombine.low %v1235_v1, %v351_v48 }
  0xa2   : > { %v370_v55 = vsel %vm368_vm7, %v364_v49, %v366_v51  ;;  %v1151_v56 = vld [vmem:[#allocation3 + $0x20] ss:$12 sps:$4 sm:$0xff]   ;;  %526 = vmatprep.subr.bf16.mxu0 %v1055_v53  ;;  %v367_v59 = vsel %vm272_vm1, %v365_v52, %v366_v51 }
  0xa3   : > { %374 = vst [vmem:[#allocation3 + $0x50] sm:$0xf] %v370_v55  ;;  %v382_v57 = vpop.permute.xlu1 %381  ;;  %v380_v58 = vpop.permute.xlu0 %379  ;;  %527 = vmatpush1.bf16.msra.mxu0 %v1054_v54  ;;  %1105 = vmatpush3.bf16.msra.mxu1 %v1151_v56  ;;  %v369_v3 = vsel %vm368_vm7, %v362_v50, %v367_v59  ;;  %v800_v54 = vld [vmem:[%s1388_s4] sm:$0xff] }
  0xa4   : > { %v384_v60 = vrot.slane %v382_v57, 4  ;;  %v383_v61 = vrot.slane %v380_v58, 4  ;;  %1106 = vmatprep.subr.bf16.mxu1 %v1171_v5 }
  0xa6   : > { %v388_v62 = vsel %vm386_vm8, %v382_v57, %v384_v60  ;;  %v385_v63 = vsel %vm272_vm1, %v383_v61, %v384_v60  ;;  %v1152_v2 = vld [vmem:[#allocation3 + $0x38] ss:$12 sps:$4 sm:$0xff]  }
  0xa7   : > { %392 = vst [vmem:[#allocation3 + $0x5c] sm:$0xf] %v388_v62  ;;  %v387_v4 = vsel %vm386_vm8, %v380_v58, %v385_v63  ;;  %v400_v6 = vpop.permute.xlu1 %399  ;;  %v398_v7 = vpop.permute.xlu0 %397  ;;  %1107 = vmatpush3.bf16.msra.mxu1 %v1152_v2 }
  0xa8   : > { %v402_v8 = vrot.slane %v400_v6, 4  ;;  %v401_v9 = vrot.slane %v398_v7, 4  ;;  %v1058_v10 = vcombine.high %v369_v3, %v387_v4  ;;  %v1057_v11 = vcombine.low %v369_v3, %v387_v4  ;;  %1108 = vmatprep.subr.bf16.mxu1 %v1171_v5 }
  0xaa   : > { %v406_v12 = vsel %vm404_vm9, %v400_v6, %v402_v8  ;;  %v403_v13 = vsel %vm272_vm1, %v401_v9, %v402_v8  ;;  %528 = vmatprep.subr.bf16.mxu0 %v1058_v10 }
  0xab   : > { %410 = vst [vmem:[#allocation3 + $0x68] sm:$0xf] %v406_v12  ;;  %v405_v14 = vsel %vm404_vm9, %v398_v7, %v403_v13  ;;  %529 = vmatpush1.bf16.msra.mxu0 %v1057_v11 }
  0xac   : > { %v1061_v15 = vcombine.high %v405_v14, %v405_v14  ;;  %v1060_v16 = vcombine.low %v405_v14, %v405_v14 }
  0xae   : > { %v1153_v17 = vld [vmem:[#allocation3 + $0x50] ss:$12 sps:$4 sm:$0xff]   ;;  %1063 = vmatprep.subr.msk.bf16.mxu0 %vm272_vm1, %v1061_v15  ;;  %v514_v18 = vsel %vm272_vm1, %v1060_v16, 0 }
  0xaf   : > { %531 = vmatpush1.bf16.msra.mxu0 %v514_v18  ;;  %1109 = vmatpush3.bf16.msra.mxu1 %v1153_v17 }
  0xb0   : > { %1110 = vmatprep.subr.bf16.mxu1 %v1171_v5 }
  0xb2   : > { %v1154_v20 = vld [vmem:[#allocation3 + $0x68] ss:$0 sps:$4 sm:$0xff]   ;;  %1064 = vmatmul.mubr.msk.bf16.vlgmr.msra.gmra.mrb[0].mxu0 %vm508_vm10, %v411_v19 }
  0xb3   : > { %922 = vmatprep.mubr.bf16.mxu0 %v1168_v0  ;;  %v520_v21 = vsel %vm272_vm1, %v1154_v20, 0 }
  0xb4   : > { %1111 = vmatpush3.bf16.msra.mxu1 %v520_v21 }
  0xb5   : > { %1116 = vmatprep.subr.bf16.mxu1 %v1171_v5 }
  0xb7   : > { %1113 = vmatmul.mubr.msk.bf16.vlgmr.msra.gmra.mrb[0].mxu1 %vm508_vm10, %v411_v19 }
  0xb8   : > { %1126 = vmatprep.mubr.msk.bf16.mxu1 %vm1178_vm0, %v1171_v5  ;;  %v434_v26 = vpop.permute.xlu0 %433 }
 0x185   : > { %v556_v0 = vpop.f32.mrb[0].mxu0 }
 0x186   : > { %v557_v28 = vadd.f32 %v556_v0, %v434_v26  ;;  %v558_v30 = vpop.f32.mrb[1].mxu0 }
 0x187   : > { %v559_v31 = vadd.f32 %v558_v30, %v434_v26  ;;  %v560_v33 = vpop.f32.mrb[2].mxu0 }
 0x188   : > { %v603_v35 = vmax.f32 %v557_v28, 0.0  ;;  %v561_v36 = vpop.f32.mrb[3].mxu0 }
 0x189   : > { %v604_v37 = vmax.f32 %v559_v31, 0.0 }
 0x18a   : > { %v623_v38 = vmul.f32 %v611_v29, %v603_v35  ;;  %v597_v39 = vpop.f32.mrb[0].mxu1 }
 0x18b   : > { %v624_v40 = vmul.f32 %v615_v32, %v604_v37  ;;  %v598_v42 = vadd.f32 %v597_v39, %v434_v26  ;;  %v1114_v43 = vpop.f32.mrb[1].mxu1 }
 0x18c   : > { %v600_v45 = vpop.f32.mrb[2].mxu1 }
 0x18d   : > { %v1310_v44 = vpack.c.bf16 %v624_v40, %v623_v38  ;;  %v605_v46 = vmax.f32 %v598_v42, 0.0  ;;  %v1115_v47 = vpop.f32.mrb[3].mxu1 }
 0x18f   : > { %639 = vst [vmem:[#allocation2 + $0x4] sm:$0xff] %v1310_v44  ;;  %v625_v48 = vmul.f32 %v619_v41, %v605_v46 }
 0x191   : > { %v1089_v49 = vpack.c.bf16 %v625_v48, %v625_v48 }
 0x193   : > { %640 = vst [vmem:[#allocation2 + $0xc] sm:$0xf] %v1089_v49 }
 0x196   : > { %v658_v50 = vld [vmem:[#allocation2] sm:$0xff] }
 0x197   : > { %662 = vrot.lane.b32.xlu0 %v658_v50, %s1169_s28 }
 0x19a   : > { %v714_v51 = vld [vmem:[#allocation2 + $0xc] sm:$0xff] }
 0x19b   : > { %679 = vrot.lane.b32.xlu0 %v658_v50, %s1172_s30  ;;  %v710_v52 = vld [vmem:[#allocation2 + $0xc] sm:$0xf]  ;;  %719 = vrot.lane.b32.xlu1 %v714_v51, %s1174_s8 }
 0x19c   : > { %712 = vst [vmem:[#allocation3 + $0x38] sm:$0xf] %v710_v52  ;;  %v642_v53 = vld [vmem:[#allocation2 + $0x8] sm:$0xff] }
 0x19f   : > { %696 = vrot.lane.b32.xlu0 %v658_v50, %s1173_s7  ;;  %645 = vrot.lane.b32.xlu1 %v658_v50, %s1170_s29 }
 0x1a3   : > { %717 = vrot.lane.b32.xlu0 %v1310_v44, %s1174_s8  ;;  %647 = vrot.lane.b32.xlu1 %v642_v53, %s1170_s29 }
 0x1a7   : > { %734 = vrot.lane.b32.xlu0 %v1310_v44, %s1175_s9  ;;  %664 = vrot.lane.b32.xlu1 %v642_v53, %s1169_s28  ;;  %s253_s28 = scalar_lea.vmem %s1390_s6, %s1047_s24 }
 0x1ab   : > { %751 = vrot.lane.b32.xlu0 %v1310_v44, %s1176_s10  ;;  %681 = vrot.lane.b32.xlu1 %v642_v53, %s1172_s30 }
 0x1af   : > { %768 = vrot.lane.b32.xlu0 %v1310_v44, %s1177_s11  ;;  %698 = vrot.lane.b32.xlu1 %v642_v53, %s1173_s7 }
 0x1b3   : > { %803 = vperm.xlu0 %1149, %v800_v54   ;;  %736 = vrot.lane.b32.xlu1 %v714_v51, %s1175_s9 }
 0x1b7   : > { %753 = vrot.lane.b32.xlu1 %v714_v51, %s1176_s10 }
 0x1bb   : > { %770 = vrot.lane.b32.xlu1 %v714_v51, %s1177_s11 }
 0x209   : > { %v663_v55 = vpop.permute.xlu0 %662 }
 0x20a   : > { %v666_v12 = vrot.slane %v663_v55, 4 }
 0x20d   : > { %v680_v56 = vpop.permute.xlu0 %679  ;;  %v720_v57 = vpop.permute.xlu1 %719 }
 0x20e   : > { %v722_v58 = vrot.slane %v720_v57, 4  ;;  %v683_v18 = vrot.slane %v680_v56, 4 }
 0x210   : > { %v725_v59 = vsel %vm350_vm6, %v720_v57, %v722_v58 }
 0x211   : > { %v697_v60 = vpop.permute.xlu0 %696  ;;  %729 = vst [vmem:[#allocation3 + $0x44] sm:$0xf] %v725_v59  ;;  %v646_v61 = vpop.permute.xlu1 %645 }
 0x212   : > { %v649_v3 = vrot.slane %v646_v61, 4  ;;  %v700_v27 = vrot.slane %v697_v60, 4 }
 0x215   : > { %v718_v62 = vpop.permute.xlu0 %717  ;;  %v648_v63 = vpop.permute.xlu1 %647 }
 0x216   : > { %v721_v2 = vrot.slane %v718_v62, 4  ;;  %v650_v4 = vrot.slane %v648_v63, 4 }
 0x218   : > { %v723_v6 = vsel %vm272_vm1, %v721_v2, %v722_v58  ;;  %v651_v7 = vsel %vm272_vm1, %v649_v3, %v650_v4  ;;  %v653_v8 = vsel %vm274_vm3, %v648_v63, %v650_v4  ;;  %v1157_v58 = vld [vmem:[#allocation3 + $0x38] ss:$12 sps:$4 sm:$0xff]   ;;  %v781_v2 = vld [vmem:[%s1387_s3] sm:$0xf] }
 0x219   : > { %v724_v9 = vsel %vm350_vm6, %v718_v62, %v723_v6  ;;  %v652_v10 = vsel %vm274_vm3, %v646_v61, %v651_v7  ;;  %657 = vst [vmem:[#allocation3 + $0x8] sm:$0xf] %v653_v8  ;;  %v665_v11 = vpop.permute.xlu1 %664  ;;  %v735_v22 = vpop.permute.xlu0 %734  ;;  %v973_v6 = vunpack.c.l.bf16 %v1235_v1 }
 0x21a   : > { %v667_v13 = vrot.slane %v665_v11, 4  ;;  %v738_v34 = vrot.slane %v735_v22, 4  ;;  %v1075_v40 = vcombine.high %v1310_v44, %v724_v9  ;;  %v1074_v47 = vcombine.low %v1310_v44, %v724_v9 }
 0x21b   : > { %v974_v9 = vunpack.c.h.bf16 %v1235_v1 }
 0x21c   : > { %v668_v14 = vsel %vm272_vm1, %v666_v12, %v667_v13  ;;  %v670_v15 = vsel %vm292_vm2, %v665_v11, %v667_v13  ;;  %v972_v12 = vld [vmem:[%s1232_s27 + $0x8] sm:$0xf] }
 0x21d   : > { %v669_v16 = vsel %vm292_vm2, %v663_v55, %v668_v14  ;;  %674 = vst [vmem:[#allocation3 + $0x14] sm:$0xf] %v670_v15  ;;  %v682_v17 = vpop.permute.xlu1 %681  ;;  %v752_v32 = vpop.permute.xlu0 %751 }
 0x21e   : > { %v684_v19 = vrot.slane %v682_v17, 4  ;;  %v1068_v20 = vcombine.low %v652_v10, %v669_v16  ;;  %v1069_v21 = vcombine.high %v652_v10, %v669_v16  ;;  %v755_v43 = vrot.slane %v752_v32, 4 }
 0x220   : > { %v685_v23 = vsel %vm272_vm1, %v683_v18, %v684_v19  ;;  %v687_v24 = vsel %vm310_vm4, %v682_v17, %v684_v19  ;;  %890 = vmatprep.subr.bf16.mxu0 %v1069_v21  ;;  %v975_v17 = vunpack.c.l.bf16 %v972_v12 }
 0x221   : > { %v686_v25 = vsel %vm310_vm4, %v680_v56, %v685_v23  ;;  %691 = vst [vmem:[#allocation3 + $0x20] sm:$0xf] %v687_v24  ;;  %v699_v26 = vpop.permute.xlu1 %698  ;;  %891 = vmatpush1.bf16.msra.mxu0 %v1068_v20  ;;  %v769_v46 = vpop.permute.xlu0 %768 }
 0x222   : > { %v701_v0 = vrot.slane %v699_v26, 4  ;;  %v772_v53 = vrot.slane %v769_v46, 4 }
 0x224   : > { %v702_v28 = vsel %vm272_vm1, %v700_v27, %v701_v0  ;;  %v704_v29 = vsel %vm328_vm5, %v699_v26, %v701_v0  ;;  %v1155_v30 = vld [vmem:[#allocation3 + $0x8] ss:$12 sps:$4 sm:$0xff]  }
 0x225   : > { %v703_v31 = vsel %vm328_vm5, %v697_v60, %v702_v28  ;;  %708 = vst [vmem:[#allocation3 + $0x2c] sm:$0xf] %v704_v29  ;;  %v737_v33 = vpop.permute.xlu1 %736  ;;  %1117 = vmatpush3.bf16.msra.mxu1 %v1155_v30 }
 0x226   : > { %v739_v35 = vrot.slane %v737_v33, 4  ;;  %v1071_v36 = vcombine.low %v686_v25, %v703_v31  ;;  %v1072_v37 = vcombine.high %v686_v25, %v703_v31  ;;  %1118 = vmatprep.subr.bf16.mxu1 %v1171_v5 }
 0x228   : > { %v740_v38 = vsel %vm272_vm1, %v738_v34, %v739_v35  ;;  %v742_v39 = vsel %vm368_vm7, %v737_v33, %v739_v35  ;;  %892 = vmatprep.subr.bf16.mxu0 %v1072_v37 }
 0x229   : > { %v741_v41 = vsel %vm368_vm7, %v735_v22, %v740_v38  ;;  %746 = vst [vmem:[#allocation3 + $0x50] sm:$0xf] %v742_v39  ;;  %v754_v42 = vpop.permute.xlu1 %753  ;;  %893 = vmatpush1.bf16.msra.mxu0 %v1071_v36 }
 0x22a   : > { %v756_v45 = vrot.slane %v754_v42, 4  ;;  %894 = vmatprep.subr.bf16.mxu0 %v1075_v40 }
 0x22c   : > { %v757_v48 = vsel %vm272_vm1, %v755_v43, %v756_v45  ;;  %v759_v49 = vsel %vm386_vm8, %v754_v42, %v756_v45  ;;  %v1156_v50 = vld [vmem:[#allocation3 + $0x20] ss:$12 sps:$4 sm:$0xff]  }
 0x22d   : > { %v758_v51 = vsel %vm386_vm8, %v752_v32, %v757_v48  ;;  %763 = vst [vmem:[#allocation3 + $0x5c] sm:$0xf] %v759_v49  ;;  %v771_v52 = vpop.permute.xlu1 %770  ;;  %895 = vmatpush1.bf16.msra.mxu0 %v1074_v47  ;;  %1119 = vmatpush3.bf16.msra.mxu1 %v1156_v50 }
 0x22e   : > { %v773_v54 = vrot.slane %v771_v52, 4  ;;  %v1077_v55 = vcombine.low %v741_v41, %v758_v51  ;;  %v1078_v56 = vcombine.high %v741_v41, %v758_v51  ;;  %1120 = vmatprep.subr.bf16.mxu1 %v1171_v5 }
 0x230   : > { %v774_v57 = vsel %vm272_vm1, %v772_v53, %v773_v54  ;;  %v776_v44 = vsel %vm404_vm9, %v771_v52, %v773_v54  ;;  %896 = vmatprep.subr.bf16.mxu0 %v1078_v56 }
 0x231   : > { %v775_v59 = vsel %vm404_vm9, %v769_v46, %v774_v57  ;;  %780 = vst [vmem:[#allocation3 + $0x68] sm:$0xf] %v776_v44  ;;  %897 = vmatpush1.bf16.msra.mxu0 %v1077_v55  ;;  %1121 = vmatpush3.bf16.msra.mxu1 %v1157_v58 }
 0x232   : > { %v1081_v60 = vcombine.high %v775_v59, %v775_v59  ;;  %v1080_v61 = vcombine.low %v775_v59, %v775_v59  ;;  %1122 = vmatprep.subr.bf16.mxu1 %v1171_v5  ;;  %v804_v7 = vpop.permute.xlu0 %803 }
 0x234   : > { %v1158_v62 = vld [vmem:[#allocation3 + $0x50] ss:$12 sps:$4 sm:$0xff]   ;;  %1083 = vmatprep.subr.msk.bf16.mxu0 %vm272_vm1, %v1081_v60  ;;  %v882_v63 = vsel %vm272_vm1, %v1080_v61, 0 }
 0x235   : > { %899 = vmatpush1.bf16.msra.mxu0 %v882_v63  ;;  %1123 = vmatpush3.bf16.msra.mxu1 %v1158_v62 }
 0x236   : > { %1124 = vmatprep.subr.bf16.mxu1 %v1171_v5 }
 0x238   : > { %v1159_v3 = vld [vmem:[#allocation3 + $0x68] ss:$0 sps:$4 sm:$0xff]   ;;  %1084 = vmatmul.mubr.msk.bf16.vlgmr.msra.gmra.mrb[4].mxu0 %vm508_vm10, %v781_v2 }
 0x239   : > { %v888_v4 = vsel %vm272_vm1, %v1159_v3, 0 }
 0x23a   : > { %1125 = vmatpush3.bf16.msra.mxu1 %v888_v4 }
 0x23d   : > { %1127 = vmatmul.mubr.msk.bf16.vlgmr.msra.gmra.mrb[4].mxu1 %vm508_vm10, %v781_v2 }
 0x30b   : > { %v924_v8 = vpop.f32.mrb[4].mxu0 }
 0x30c   : > { %v925_v10 = vadd.f32 %v924_v8, %v804_v7  ;;  %v926_v11 = vpop.f32.mrb[5].mxu0 }
 0x30d   : > { %v927_v13 = vadd.f32 %v926_v11, %v804_v7  ;;  %v928_v5 = vpop.f32.mrb[6].mxu0 }
 0x30e   : > { %v976_v14 = vadd.f32 %v973_v6, %v925_v10  ;;  %v929_v15 = vpop.f32.mrb[7].mxu0 }
 0x30f   : > { %v977_v16 = vadd.f32 %v974_v9, %v927_v13 }
 0x310   : > { %v979_v18 = vmax.f32 %v976_v14, 0.0  ;;  %v965_v19 = vpop.f32.mrb[4].mxu1 }
 0x311   : > { %v980_v20 = vmax.f32 %v977_v16, 0.0  ;;  %v966_v21 = vadd.f32 %v965_v19, %v804_v7  ;;  %v1128_v1 = vpop.f32.mrb[5].mxu1 }
 0x312   : > { %982 = vst [vmem:[%s253_s28] sm:$0xff] %v979_v18  ;;  %v968_v22 = vpop.f32.mrb[6].mxu1 }
 0x313   : > { %983 = vst [vmem:[%s253_s28 + $0x8] sm:$0xff] %v980_v20  ;;  %v978_v23 = vadd.f32 %v975_v17, %v966_v21  ;;  %v1129_v24 = vpop.f32.mrb[7].mxu1 }
 0x315   : > { %v981_v25 = vmax.f32 %v978_v23, 0.0 }
 0x317   : > { %984 = vst [vmem:[%s253_s28 + $0x10] sm:$0xff] %v981_v25 }
 0x318 PF: > { %s16_s21 = sadd.s32 1, %s1166_s21  }
 0x319   : > { %p13_p4 = scmp.ge.s32.totalorder %s16_s21, 4  }
 0x31b   :  { %15 = sbr.rel (!%p13_p4) target bundleno = 1 (0x1), region = 74 }

</bundles_post_ra>
